<compile_context>
chip_gen: v7x
topology: tpu7x:2x2x1
jax: 0.10.0
libtpu: 0.0.40
codegen_flags: <defaults>
</compile_context>

<pallas_src>
import functools

import numpy as np
import jax
import jax.numpy as jnp
from jax import lax
from jax.experimental import pallas as pl
from jax.experimental.pallas import tpu as pltpu


def _avg_counts(L, kernel_size):
    """(L, L) integer-valued matrix M with (M @ x) / kernel_size == moving_avg(x).

    Row t holds window-membership counts of the edge-replicated average: ones
    on the band |t-j| <= pad, plus clipped-window extra counts folded into
    columns 0 and L-1.  Every entry is a small integer <= kernel_size, hence
    exactly representable in bf16 and f32.
    """
    pad = (kernel_size - 1) // 2
    ti = np.arange(L)[:, None]
    tj = np.arange(L)[None, :]
    a = (np.abs(ti - tj) <= pad).astype(np.float32)
    a[:, 0] += np.maximum(pad - np.arange(L), 0)
    a[:, L - 1] += np.maximum(np.arange(L) + pad - (L - 1), 0)
    return a


def _choose_time_tile(L):
    if L <= 512:
        return L                    # dense single block; A is tiny here anyway
    for lt in range(512, 63, -8):   # largest multiple-of-8 divisor of L <= 512
        if L % lt == 0:
            return lt
    # TODO(synk): for awkward L with no multiple-of-8 divisor, pad the time
    # axis in the wrapper instead of falling back to the dense (L, L) matmul.
    return L


def _choose_channel_tile(C):
    for cand in (512, 256, 128):    # >=256 preferred for v6e/v7x 2x256 MXU
        if C % cand == 0:
            return cand
    # TODO(synk): for tiny C (< 128 lanes) pad channels to 128 in the wrapper
    # when B*L is large enough to amortize the extra HBM pass (avoids masked
    # vst.msk partial stores); kept as-is for small Autoformer configs.
    return C


def _build_slabs(L, kernel_size, lt):
    """Banded slabs of the count matrix plus the x-window start of each slab."""
    pad = (kernel_size - 1) // 2
    n_tb = L // lt
    pad_r = 0 if n_tb == 1 else -(-pad // 8) * 8    # round halo up to sublanes
    lt_halo = min(lt + 2 * pad_r, L)
    a_full = _avg_counts(L, kernel_size)
    slabs = np.zeros((n_tb, lt, lt_halo), np.float32)
    starts = []
    for t in range(n_tb):
        s = max(0, min(t * lt - pad_r, L - lt_halo))
        starts.append(s)
        slabs[t] = a_full[t * lt:(t + 1) * lt, s:s + lt_halo]
    return slabs, tuple(starts), lt_halo


def _decomp_kernel(a_ref, x_ref, res_ref, *mean_refs, starts, lt, lt_halo,
                   inv_k, precision):
    """One grid step: one batch element, one lane-dense channel tile."""
    mean_ref = mean_refs[0] if mean_refs else None
    for t, s in enumerate(starts):                 # static, short (n_tb small)
        a = a_ref[t]                               # (lt, lt_halo)  counts
        xh = x_ref[pl.ds(s, lt_halo), :]           # (lt_halo, c_t) halo'd window
        m = jnp.dot(a, xh, preferred_element_type=jnp.float32,
                    precision=precision) * inv_k   # MXU, f32 accumulate, VPU scale
        r0 = t * lt
        xb = x_ref[pl.ds(r0, lt), :]
        res_ref[pl.ds(r0, lt), :] = (xb.astype(jnp.float32) - m).astype(res_ref.dtype)
        if mean_ref is not None:
            mean_ref[pl.ds(r0, lt), :] = m.astype(mean_ref.dtype)


@functools.partial(jax.jit, static_argnames=("kernel_size", "return_mean"))
def series_decomp(x, kernel_size, return_mean=True):
    """x: (B, L, C) -> (res, moving_mean) (or res only if return_mean=False)."""
    if kernel_size < 1 or kernel_size % 2 == 0:
        # The PyTorch module crashes for even kernel_size (shape mismatch);
        # be explicit instead of silently diverging.
        raise ValueError("series_decomp requires an odd kernel_size >= 1")
    B, L, C = x.shape
    lt = _choose_time_tile(L)
    c_t = _choose_channel_tile(C)
    slabs_np, starts, lt_halo = _build_slabs(L, kernel_size, lt)
    n_tb = slabs_np.shape[0]

    if x.dtype == jnp.bfloat16:
        a_dtype = jnp.bfloat16                 # counts are small ints: exact
        precision = None                       # full-rate bf16 MXU
    else:
        a_dtype = jnp.float32
        precision = lax.Precision.HIGHEST      # exact f32 moving mean

    a = jnp.asarray(slabs_np, dtype=a_dtype)

    # Real VMEM budget: A (2 pipeline buffers) + double-buffered x tile +
    # double-buffered output tiles + headroom for matmul intermediates.
    itemsize = jnp.dtype(x.dtype).itemsize
    x_tile_bytes = L * c_t * itemsize
    a_bytes = int(a.size) * jnp.dtype(a_dtype).itemsize
    n_out = 2 if return_mean else 1
    vmem_bytes = 2 * a_bytes + 2 * (1 + n_out) * x_tile_bytes + (6 << 20)
    vmem_limit = int(min(max(vmem_bytes, 16 << 20), 64 << 20))

    grid = (B, C // c_t)
    a_spec = pl.BlockSpec((n_tb, lt, lt_halo), lambda b, c: (0, 0, 0))  # resident
    x_spec = pl.BlockSpec((None, L, c_t), lambda b, c: (b, 0, c))
    out_spec = pl.BlockSpec((None, L, c_t), lambda b, c: (b, 0, c))

    out_shape = jax.ShapeDtypeStruct((B, L, C), x.dtype)
    kernel = functools.partial(
        _decomp_kernel, starts=starts, lt=lt, lt_halo=lt_halo,
        inv_k=1.0 / kernel_size, precision=precision)

    outs = pl.pallas_call(
        kernel,
        out_shape=(out_shape, out_shape) if return_mean else out_shape,
        grid_spec=pltpu.PrefetchScalarGridSpec(
            num_scalar_prefetch=0,
            grid=grid,
            in_specs=[a_spec, x_spec],
            out_specs=[out_spec, out_spec] if return_mean else out_spec,
        ),
        compiler_params=pltpu.CompilerParams(
            dimension_semantics=("parallel", "parallel"),
            vmem_limit_bytes=vmem_limit,
        ),
    )(a, x)
    if return_mean:
        res, mean = outs
        return res, mean
    return outs


def _reference(x, kernel_size):
    # Pure-JAX reference implementing the PyTorch semantics.
    pad = (kernel_size - 1) // 2
    front = jnp.repeat(x[:, 0:1, :], pad, axis=1)
    end = jnp.repeat(x[:, -1:, :], pad, axis=1)
    xp = jnp.concatenate([front, x, end], axis=1)          # (B, L+k-1, C)
    L = x.shape[1]
    windows = jnp.stack([xp[:, i:i + L, :] for i in range(kernel_size)], axis=0)
    mean = jnp.mean(windows, axis=0)
    return x - mean, mean


if __name__ == "__main__":
    key = jax.random.PRNGKey(0)

    # Case 1: tiny channel count (c_t = C path), dense single time block.
    B, L, C, k = 2, 16, 8, 5
    x = jax.random.normal(key, (B, L, C), dtype=jnp.float32)
    res, mean = jax.block_until_ready(series_decomp(x, kernel_size=k))
    res_ref, mean_ref = _reference(x, k)
    assert res.shape == (B, L, C) and mean.shape == (B, L, C)
    assert jnp.allclose(mean, mean_ref, atol=1e-5), "moving_mean mismatch (case 1)"
    assert jnp.allclose(res, res_ref, atol=1e-5), "residual mismatch (case 1)"

    # Case 2: lane-dense channel tiling (C % 256 == 0), dense single time block.
    B2, L2, C2, k2 = 2, 24, 256, 7
    x2 = jax.random.normal(jax.random.PRNGKey(0), (B2, L2, C2), dtype=jnp.float32)
    res2, mean2 = jax.block_until_ready(series_decomp(x2, kernel_size=k2))
    res2_ref, mean2_ref = _reference(x2, k2)
    assert jnp.allclose(mean2, mean2_ref, atol=1e-5), "moving_mean mismatch (case 2)"
    assert jnp.allclose(res2, res2_ref, atol=1e-5), "residual mismatch (case 2)"

    # Case 3: banded time-tiled path (L > 512, Autoformer default k=25) and the
    # res-only variant used by encoder call sites.
    B3, L3, C3, k3 = 1, 640, 128, 25
    x3 = jax.random.normal(jax.random.PRNGKey(1), (B3, L3, C3), dtype=jnp.float32)
    res3, mean3 = jax.block_until_ready(series_decomp(x3, kernel_size=k3))
    res3_ref, mean3_ref = _reference(x3, k3)
    assert jnp.allclose(mean3, mean3_ref, atol=1e-4), "moving_mean mismatch (case 3)"
    assert jnp.allclose(res3, res3_ref, atol=1e-4), "residual mismatch (case 3)"
    res3_only = jax.block_until_ready(
        series_decomp(x3, kernel_size=k3, return_mean=False))
    assert jnp.allclose(res3_only, res3), "res-only variant mismatch"

    print("KERNEL_OK")
</pallas_src>

<mosaic_0001>
module attributes {stable_mosaic.version = 11 : i64} {
  func.func @_decomp_kernel(%arg0: i32, %arg1: i32, %arg2: memref<1x16x16xf32, #tpu.memory_space<vmem>>, %arg3: memref<1x16x8xf32, #tpu.memory_space<vmem>>, %arg4: memref<1x16x8xf32, #tpu.memory_space<vmem>>, %arg5: memref<1x16x8xf32, #tpu.memory_space<vmem>>) attributes {dimension_semantics = [#tpu.dimension_semantics<parallel>, #tpu.dimension_semantics<parallel>], iteration_bounds = array<i64: 2, 1>, scalar_prefetch = 0 : i64, scratch_operands = 0 : i64, tpu.core_type = #tpu.core_type<tc>, window_params = [{pipeline_mode = #tpu.pipeline_mode<synchronous>, transform_indices = @transform_0, window_bounds = array<i64: 1, 16, 16>}, {transform_indices = @transform_1, window_bounds = array<i64: 1, 16, 8>}, {transform_indices = @transform_2, window_bounds = array<i64: 1, 16, 8>}, {transform_indices = @transform_3, window_bounds = array<i64: 1, 16, 8>}]} {
    %c0 = arith.constant 0 : index
    %c0_0 = arith.constant 0 : index
    %c0_1 = arith.constant 0 : index
    %0 = vector.load %arg2[%c0, %c0_0, %c0_1] : memref<1x16x16xf32, #tpu.memory_space<vmem>>, vector<1x16x16xf32>
    %1 = vector.shape_cast %0 : vector<1x16x16xf32> to vector<16x16xf32>
    %c0_2 = arith.constant 0 : index
    %c0_3 = arith.constant 0 : index
    %c0_4 = arith.constant 0 : index
    %2 = vector.load %arg3[%c0_2, %c0_3, %c0_4] : memref<1x16x8xf32, #tpu.memory_space<vmem>>, vector<1x16x8xf32>
    %3 = vector.shape_cast %2 : vector<1x16x8xf32> to vector<16x8xf32>
    %cst = arith.constant dense<0.000000e+00> : vector<16x8xf32>
    %4 = tpu.matmul %1, %3, %cst {dimension_numbers = #tpu.dot_dimension_numbers<[1], [0], [0], [1], [0, 0, 1, 1], [], []>, precision = #tpu.contract_precision<fp32>} : vector<16x16xf32>, vector<16x8xf32>, vector<16x8xf32> -> vector<16x8xf32>
    %cst_5 = arith.constant 2.000000e-01 : f32
    %5 = vector.broadcast %cst_5 : f32 to vector<16x8xf32>
    %6 = arith.mulf %4, %5 : vector<16x8xf32>
    %c0_6 = arith.constant 0 : index
    %c0_7 = arith.constant 0 : index
    %c0_8 = arith.constant 0 : index
    %7 = vector.load %arg3[%c0_6, %c0_7, %c0_8] : memref<1x16x8xf32, #tpu.memory_space<vmem>>, vector<1x16x8xf32>
    %8 = vector.shape_cast %7 : vector<1x16x8xf32> to vector<16x8xf32>
    %9 = arith.subf %8, %6 : vector<16x8xf32>
    %c0_9 = arith.constant 0 : index
    %c0_10 = arith.constant 0 : index
    %c0_11 = arith.constant 0 : index
    %10 = vector.load %arg4[%c0_9, %c0_10, %c0_11] : memref<1x16x8xf32, #tpu.memory_space<vmem>>, vector<1x16x8xf32>
    %11 = vector.shape_cast %10 : vector<1x16x8xf32> to vector<16x8xf32>
    %12 = vector.shape_cast %9 : vector<16x8xf32> to vector<1x16x8xf32>
    tpu.vector_store %arg4[%c0_9, %c0_10, %c0_11], %12 {strides = array<i32>} : memref<1x16x8xf32, #tpu.memory_space<vmem>>, vector<1x16x8xf32>,
    %c0_12 = arith.constant 0 : index
    %c0_13 = arith.constant 0 : index
    %c0_14 = arith.constant 0 : index
    %13 = vector.load %arg5[%c0_12, %c0_13, %c0_14] : memref<1x16x8xf32, #tpu.memory_space<vmem>>, vector<1x16x8xf32>
    %14 = vector.shape_cast %13 : vector<1x16x8xf32> to vector<16x8xf32>
    %15 = vector.shape_cast %6 : vector<16x8xf32> to vector<1x16x8xf32>
    tpu.vector_store %arg5[%c0_12, %c0_13, %c0_14], %15 {strides = array<i32>} : memref<1x16x8xf32, #tpu.memory_space<vmem>>, vector<1x16x8xf32>,
    return
  }
  func.func @transform_0(%arg0: i32, %arg1: i32) -> (i32, i32, i32) {
    %c0_i32 = arith.constant 0 : i32
    %c0_i32_0 = arith.constant 0 : i32
    %c0_i32_1 = arith.constant 0 : i32
    %c0_i32_2 = arith.constant 0 : i32
    return %c0_i32, %c0_i32_0, %c0_i32_1 : i32, i32, i32
  }
  func.func @transform_1(%arg0: i32, %arg1: i32) -> (i32, i32, i32) {
    %c0_i32 = arith.constant 0 : i32
    %c0_i32_0 = arith.constant 0 : i32
    return %arg0, %c0_i32, %arg1 : i32, i32, i32
  }
  func.func @transform_2(%arg0: i32, %arg1: i32) -> (i32, i32, i32) {
    %c0_i32 = arith.constant 0 : i32
    %c0_i32_0 = arith.constant 0 : i32
    return %arg0, %c0_i32, %arg1 : i32, i32, i32
  }
  func.func @transform_3(%arg0: i32, %arg1: i32) -> (i32, i32, i32) {
    %c0_i32 = arith.constant 0 : i32
    %c0_i32_0 = arith.constant 0 : i32
    return %arg0, %c0_i32, %arg1 : i32, i32, i32
  }
}

</mosaic_0001>

<bundles_post_ra>
// kernel: series_decomp.1
= control target key start
LH: loop header
LB: loop body
LE: loop exit
PB: predicated region body
PF: predicated region fallthrough
CT: control target
= control target key end

     0   :  { %s1059_s12 = smov 0   ;;  %s1061_s13 = smov 0   ;;  %s1111_s0 = inlined_call_operand.vmem [shape: f32[1,16,16], index: 0, kind: input, shape index: {}]   ;;  %s1112_s1 = inlined_call_operand.vmem [shape: f32[2,16,8], index: 1, kind: input, shape index: {}]   ;;  %s1113_s2 = inlined_call_operand.vmem [shape: f32[2,16,8], index: 2, kind: output, shape index: {0}]   ;;  %s1114_s3 = inlined_call_operand.vmem [shape: f32[2,16,8], index: 3, kind: output, shape index: {1}]  }
   0x1   :  { %s1063_s14 = smov 0  }
   0x2 LB: > { %s26_s15 = sadd.s32 1, %s1033_s13  ;;  %p879_p0 = scmp.ge.s32.totalorder %s1037_s14, 1  ;;  %s1037_s14 = sphi %s1063_s14, %s14_s14   ;;  %s1033_s13 = sphi %s1061_s13, %s1116_s13   ;;  %s1029_s12 = sphi %s1059_s12, %s1115_s12  }
   0x3   : > { %p28_p1 = scmp.ge.s32.totalorder %s26_s15, 2  ;;  %p161_p2 = scmp.lt.s32.totalorder %s1037_s14, 3 }
   0x5   : > { %s1118_s15 = smov (%p28_p1, %s26_s15), 0  ;;  %p162_p3 = pnand %p879_p0, %p161_p2 }
   0x6   : > { %p199_p4 = scmp.lt.s32.totalorder (!%p162_p3), %s1029_s12, 1  ;;  %v223_v0 = vld [vmem:[%s1111_s0] sm:$0xff] (!%p162_p3)  ;;  %v224_v1 = vld [vmem:[%s1111_s0 + $0x8] sm:$0xff] (!%p162_p3)  ;;  %vm227_vm0 = vcmask (!%p162_p3), 130048   ;;  %vm740_vm1 = vcmask (!%p162_p3), 64512  }
   0x7   : > { %165 = sbr.rel (%p162_p3) target bundleno = 262 (0x106), region = 28  ;;  %v229_v2 = vsel (!%p162_p3), %vm227_vm0, %v223_v0, 0  ;;  %v232_v3 = vsel (!%p162_p3), %vm227_vm0, %v224_v1, 0 }
   0x8   : > { %v301_v4 = vand.u32 (!%p162_p3), 4294901760, %v229_v2  ;;  %v311_v5 = vand.u32 (!%p162_p3), 4294901760, %v232_v3 }
   0xa   : > { %v302_v6 = vsub.f32 (!%p162_p3), %v229_v2, %v301_v4  ;;  %v312_v7 = vsub.f32 (!%p162_p3), %v232_v3, %v311_v5 }
   0xc   : > { %v303_v10 = vand.u32 (!%p162_p3), 4294901760, %v302_v6  ;;  %v313_v11 = vand.u32 (!%p162_p3), 4294901760, %v312_v7 }
   0xe   : > { %s1120_s12 = smov (!%p199_p4, %s1029_s12), 1  ;;  %v304_v14 = vsub.f32 %v302_v6, %v303_v10  ;;  %940 = vmatprep.mubr.f32.mxu0 %v303_v10  ;;  %v314_v15 = vsub.f32 %v312_v7, %v313_v11 }
   0xf   : > { %s1083_s20 = sshll.u32 %s1120_s12, 4 }
  0x10   : > { %s206_s23 = scalar_lea.vmem %s1112_s1, %s1083_s20  ;;  %v305_v19 = vand.u32 4294901760, %v304_v14  ;;  %v315_v20 = vand.u32 4294901760, %v314_v15  ;;  %s222_s26 = scalar_lea.vmem %s1114_s3, %s1083_s20 }
  0x11   : > { %v1089_v8 = vld [vmem:[%s206_s23] sm:$0xff]  ;;  %v226_v9 = vld [vmem:[%s206_s23 + $0x8] sm:$0xff]  ;;  %s214_s29 = scalar_lea.vmem %s1113_s2, %s1083_s20 }
  0x12   : > { %v235_v12 = vand.u32 4294901760, %v1089_v8  ;;  %v238_v13 = vand.u32 4294901760, %v226_v9  ;;  %919 = vmatprep.mubr.f32.mxu1 %v305_v19 }
  0x14   : > { %v957_v16 = vpack.c.bf16 %v238_v13, %v235_v12  ;;  %v323_v17 = vsub.f32 %v1089_v8, %v235_v12  ;;  %v330_v18 = vsub.f32 %v226_v9, %v238_v13 }
  0x16   : > { %958 = vmatprep.subr.bf16.mxu1 %v957_v16  ;;  %970 = vmatprep.subr.bf16.mxu0 %v957_v16  ;;  %v324_v21 = vand.u32 4294901760, %v323_v17  ;;  %v331_v22 = vand.u32 4294901760, %v330_v18  ;;  %v965_v29 = vpack.c.bf16 %v330_v18, %v323_v17 }
  0x17   : > { %960 = vmatpush3.bf16.msra.mxu1 %v957_v16  ;;  %972 = vmatpush3.bf16.msra.mxu0 %v957_v16 }
  0x18   : > { %v325_v23 = vsub.f32 %v323_v17, %v324_v21  ;;  %v332_v24 = vsub.f32 %v330_v18, %v331_v22  ;;  %v973_v25 = vpack.c.bf16 %v331_v22, %v324_v21 }
  0x1a   : > { %920 = vmatmul.mubr.f32.vlgmr.msra.gmra.mrb[0].mxu1 %v315_v20  ;;  %941 = vmatmul.mubr.f32.vlgmr.msra.gmra.mrb[0].mxu0 %v313_v11  ;;  %v326_v26 = vand.u32 4294901760, %v325_v23  ;;  %v333_v27 = vand.u32 4294901760, %v332_v24 }
  0x1b   : > { %974 = vmatprep.subr.bf16.mxu0 %v973_v25  ;;  %926 = vmatprep.mubr.f32.mxu1 %v301_v4 }
  0x1c   : > { %v961_v28 = vpack.c.bf16 %v333_v27, %v326_v26  ;;  %976 = vmatpush3.bf16.msra.mxu0 %v973_v25  ;;  %947 = vmatprep.mubr.f32.mxu0 %v301_v4 }
  0x1d   : > { %978 = vmatprep.subr.bf16.mxu0 %v957_v16 }
  0x1e   : > { %962 = vmatprep.subr.bf16.mxu1 %v961_v28 }
  0x1f   : > { %964 = vmatpush3.bf16.msra.mxu1 %v961_v28 }
  0x20   : > { %966 = vmatprep.subr.bf16.mxu1 %v965_v29 }
  0x22   : > { %927 = vmatmul.mubr.f32.vlgmr.msra.gmra.mrb[0].mxu1 %v311_v5  ;;  %948 = vmatmul.mubr.f32.vlgmr.msra.gmra.mrb[0].mxu0 %v311_v5 }
  0x23   : > { %968 = vmatpush3.bf16.msra.mxu1 %v965_v29  ;;  %980 = vmatpush3.bf16.msra.mxu0 %v957_v16 }
  0x24   : > { %933 = vmatprep.mubr.f32.mxu1 %v302_v6  ;;  %954 = vmatprep.mubr.f32.mxu0 %v301_v4 }
  0x2a   : > { %934 = vmatmul.mubr.f32.vlgmr.msra.gmra.mrb[0].mxu1 %v312_v7  ;;  %955 = vmatmul.mubr.f32.vlgmr.msra.gmra.mrb[0].mxu0 %v311_v5 }
  0xfd   : > { %v935_v30 = vpop.f32.mrb[0].mxu1  ;;  %v956_v31 = vpop.f32.mrb[0].mxu0 }
  0xfe   : > { %v981_v32 = vadd.f32 %v956_v31, %v935_v30  ;;  %v480_v33 = vpop.f32.mrb[1].mxu1  ;;  %v726_v34 = vpop.f32.mrb[1].mxu0 }
  0xff   : > { %v982_v35 = vadd.f32 %v726_v34, %v480_v33 }
 0x100   : > { %v737_v36 = vmul.f32 0.2, %v981_v32 }
 0x101   : > { %v736_v37 = vmul.f32 0.2, %v982_v35 }
 0x102   : > { %v739_v38 = vsub.f32 %v226_v9, %v737_v36  ;;  %744 = vst.msk [vmem:[%s222_s26 + $0x8] sm:$0xff] %vm740_vm1, %v737_v36 }
 0x103   : > { %v738_v39 = vsub.f32 %v1089_v8, %v736_v37  ;;  %743 = vst.msk [vmem:[%s222_s26] sm:$0xff] %vm740_vm1, %v736_v37 }
 0x104   : > { %742 = vst.msk [vmem:[%s214_s29 + $0x8] sm:$0xff] %vm740_vm1, %v739_v38 }
 0x105   : > { %741 = vst.msk [vmem:[%s214_s29] sm:$0xff] %vm740_vm1, %v738_v39 }
 0x106 PF: > { %s14_s14 = sadd.s32 1, %s1037_s14   ;;  %s1115_s12 = smov %s1033_s13 }
 0x107   : > { %p11_p5 = scmp.ge.s32.totalorder %s14_s14, 4   ;;  %s1116_s13 = smov %s1118_s15 }
 0x109   :  { %13 = sbr.rel (!%p11_p5) target bundleno = 2 (0x2), region = 70 }

</bundles_post_ra>
